<compile_context>
chip_gen: v5e
topology: v5e:2x2
jax: 0.10.0
libtpu: 0.0.40
codegen_flags: <defaults>
</compile_context>

<pallas_src>
import functools

import jax
import jax.numpy as jnp
from jax.experimental import pallas as pl
from jax.experimental.pallas import tpu as pltpu


def _round_up(x, m):
    return -(-x // m) * m


def _ia3_kernel_acc(x_ref, w_ref, din_ref, dout_ref, b_ref, o_ref, acc_ref, *, tk, tn):
    """Multi-K-step body: f32 VMEM accumulator across the trailing 'arbitrary' axis."""
    j = pl.program_id(1)
    k = pl.program_id(2)

    @pl.when(k == 0)
    def _():
        acc_ref[...] = jnp.zeros_like(acc_ref)

    # IA3 input scaling applied to the small x tile (per-lane VPU broadcast of a
    # (1, tk) slice of the VMEM-resident d_in row), NOT to the (tk, tn) weight block.
    koff = pl.multiple_of(k * tk, tk)
    x_scaled = x_ref[...] * din_ref[:, pl.ds(koff, tk)]
    acc_ref[...] += jnp.dot(x_scaled, w_ref[...], preferred_element_type=jnp.float32)

    @pl.when(k == pl.num_programs(2) - 1)
    def _():
        # Epilogue: output-side scaling + bias, once per (i, j) output tile.
        joff = pl.multiple_of(j * tn, tn)
        o_ref[...] = (acc_ref[...] * dout_ref[:, pl.ds(joff, tn)]
                      + b_ref[:, pl.ds(joff, tn)]).astype(o_ref.dtype)


def _ia3_kernel_single_k(x_ref, w_ref, din_ref, dout_ref, b_ref, o_ref, *, tn):
    """Single-K-step body (K fits one tile): no accumulator load/add/store round-trip."""
    j = pl.program_id(1)
    x_scaled = x_ref[...] * din_ref[...]
    acc = jnp.dot(x_scaled, w_ref[...], preferred_element_type=jnp.float32)
    joff = pl.multiple_of(j * tn, tn)
    o_ref[...] = (acc * dout_ref[:, pl.ds(joff, tn)]
                  + b_ref[:, pl.ds(joff, tn)]).astype(o_ref.dtype)


def _vmem_budget_bytes():
    """Generation-aware VMEM cap: ~75% of physical (48 MiB on v7x, 96 MiB on v5e/v6e)."""
    default_cap = 64 * 1024 * 1024  # conservative (v7x-sized) assumption
    try:
        cap = int(getattr(pltpu.get_tpu_info(), "vmem_capacity_bytes", default_cap))
    except Exception:
        cap = default_cap
    return max(32 * 1024 * 1024, (cap * 3) // 4)


@functools.partial(jax.jit, static_argnames=("tm", "tn", "tk", "compute_dtype"))
def ia3_linear(x, w, d_in, d_out, bias, *, tm=512, tn=512, tk=1024, compute_dtype=None):
    """IA3 linear forward.

    x:     [*, K]
    w:     [K, N]   (fan_in_fan_out convention, as stored by IA3Linear)
    d_in:  [K]      (ones if mode does not use it)
    d_out: [N]      (ones if mode does not use it)
    bias:  [N]      (zeros if bias=False)
    compute_dtype: optional narrow dtype (e.g. jnp.bfloat16) for x/w/d_in; the
        matmul still accumulates in f32 and d_out/bias stay f32 in the epilogue.
    returns [*, N] in x's original dtype.
    """
    lead_shape = x.shape[:-1]
    K = x.shape[-1]
    N = w.shape[-1]
    out_dtype = x.dtype

    cdt = compute_dtype if compute_dtype is not None else x.dtype
    x2d = x.reshape(-1, K).astype(cdt)
    wc = w.astype(cdt)
    M = x2d.shape[0]

    # Tile alignment safety (lane/sublane rules).
    tm = _round_up(max(tm, 8), 8)
    tn = _round_up(max(tn, 128), 128)
    tk = _round_up(max(tk, 128), 128)

    # Effective tiles: a block equal to the full array dim always satisfies the
    # (8,128) rule; otherwise use the preferred aligned tile and zero-pad.
    # For small M, round up to a multiple of 8 so epilogue stores stay unmasked.
    tm_e = _round_up(M, 8) if M <= tm else tm
    tk_e = K if K <= tk else tk
    tn_e = N if N <= tn else tn

    Mp = _round_up(M, tm_e)
    grid_m = Mp // tm_e
    # v7x megacore: if the M grid collapses to one step and N fits a single tile,
    # split N so a "parallel" axis has >= 2 iterations across the 2 TensorCores.
    if grid_m == 1 and tn_e == N and N >= 256:
        tn_e = max(128, _round_up(-(-N // 2), 128))

    Kp = _round_up(K, tk_e)
    Np = _round_up(N, tn_e)

    xp = x2d if (Mp, Kp) == (M, K) else jnp.pad(x2d, ((0, Mp - M), (0, Kp - K)))
    wp = wc if (Kp, Np) == (K, N) else jnp.pad(wc, ((0, Kp - K), (0, Np - N)))
    # Small per-feature rows: fully VMEM-resident inside the kernel (constant
    # index_map), sliced per tile with pl.ds instead of a fresh tiny DMA per step.
    din_row = jnp.pad(d_in.astype(cdt).reshape(1, K), ((0, 0), (0, Kp - K)))
    dout_row = jnp.pad(d_out.astype(jnp.float32).reshape(1, N), ((0, 0), (0, Np - N)))
    b_row = jnp.pad(bias.astype(jnp.float32).reshape(1, N), ((0, 0), (0, Np - N)))

    grid = (Mp // tm_e, Np // tn_e, Kp // tk_e)
    n_k = grid[2]

    # VMEM: double-buffered x/w/out tiles + resident rows (+ f32 accumulator).
    bx = xp.dtype.itemsize
    bw = wp.dtype.itemsize
    bo = jnp.zeros((), out_dtype).dtype.itemsize
    vmem_needed = (2 * (tm_e * tk_e * bx + tk_e * tn_e * bw + tm_e * tn_e * bo)
                   + 2 * (Kp * bx + 2 * Np * 4)
                   + (4 * tm_e * tn_e if n_k > 1 else 0))
    vmem_limit = int(min(_vmem_budget_bytes(),
                         max(32 * 1024 * 1024, 2 * vmem_needed)))

    in_specs = [
        pl.BlockSpec((tm_e, tk_e), lambda i, j, k: (i, k)),   # x tile
        pl.BlockSpec((tk_e, tn_e), lambda i, j, k: (k, j)),   # w tile (streamed)
        pl.BlockSpec((1, Kp), lambda i, j, k: (0, 0)),        # d_in  (resident)
        pl.BlockSpec((1, Np), lambda i, j, k: (0, 0)),        # d_out (resident)
        pl.BlockSpec((1, Np), lambda i, j, k: (0, 0)),        # bias  (resident)
    ]
    out_spec = pl.BlockSpec((tm_e, tn_e), lambda i, j, k: (i, j))

    if n_k == 1:
        kernel = functools.partial(_ia3_kernel_single_k, tn=tn_e)
        scratch = []
    else:
        kernel = functools.partial(_ia3_kernel_acc, tk=tk_e, tn=tn_e)
        scratch = [pltpu.VMEM((tm_e, tn_e), jnp.float32)]

    out = pl.pallas_call(
        kernel,
        out_shape=jax.ShapeDtypeStruct((Mp, Np), out_dtype),
        grid_spec=pltpu.PrefetchScalarGridSpec(
            num_scalar_prefetch=0,
            grid=grid,
            in_specs=in_specs,
            out_specs=out_spec,
            scratch_shapes=scratch,
        ),
        compiler_params=pltpu.CompilerParams(
            dimension_semantics=("parallel", "parallel", "arbitrary"),
            vmem_limit_bytes=vmem_limit,
        ),
    )(xp, wp, din_row, dout_row, b_row)

    if (Mp, Np) != (M, N):
        out = out[:M, :N]
    return out.reshape(*lead_shape, N)


def make_ia3_params(key, in_features, out_features, mode="in_out", bias=True):
    """Deterministic synthetic parameter init (mirrors IA3Linear.__init__ shapes)."""
    k_w, k_din, k_dout, k_b = jax.random.split(key, 4)
    w = jax.random.normal(k_w, (in_features, out_features), jnp.float32)
    # Absent factor == multiply by 1.0 (exact no-op), matching the mode switch.
    if mode in ("in", "in_out"):
        d_in = jax.random.normal(k_din, (in_features,), jnp.float32)
    else:
        d_in = jnp.ones((in_features,), jnp.float32)
    if mode in ("out", "in_out"):
        d_out = jax.random.normal(k_dout, (out_features,), jnp.float32)
    else:
        d_out = jnp.ones((out_features,), jnp.float32)
    if bias:
        b = jax.random.normal(k_b, (out_features,), jnp.float32)
    else:
        b = jnp.zeros((out_features,), jnp.float32)
    return w, d_in, d_out, b


def _reference(x, w, d_in, d_out, bias):
    # Pure-JAX reference identical to the PyTorch unmerged forward ('in_out' mode).
    w_scaled = w * d_in.reshape(-1, 1) * d_out.reshape(1, -1)
    return x @ w_scaled + bias.reshape(-1)


if __name__ == "__main__":
    key = jax.random.PRNGKey(0)
    k_x, k_p, k_x2, k_p2, k_x3, k_p3 = jax.random.split(key, 6)

    # --- case 1: small shapes matching typical module use (single-K fast path) ---
    batch, seq = 2, 8
    in_features, out_features = 32, 128
    x = jax.random.normal(k_x, (batch, seq, in_features), jnp.float32)
    w, d_in, d_out, bias = make_ia3_params(k_p, in_features, out_features,
                                           mode="in_out", bias=True)
    y = jax.block_until_ready(ia3_linear(x, w, d_in, d_out, bias))
    y_ref = _reference(x, w, d_in, d_out, bias)
    assert y.shape == (batch, seq, out_features)
    assert jnp.allclose(y, y_ref, atol=1e-4, rtol=1e-5)

    # --- case 2: forced tiny tiles -> exercises M padding, multi-tile N and the
    #     multi-step K reduction with the f32 VMEM accumulator ---
    batch2, seq2 = 2, 10
    in2, out2 = 256, 256
    x2 = jax.random.normal(k_x2, (batch2, seq2, in2), jnp.float32)
    w2, d_in2, d_out2, bias2 = make_ia3_params(k_p2, in2, out2,
                                               mode="in_out", bias=True)
    y2 = jax.block_until_ready(
        ia3_linear(x2, w2, d_in2, d_out2, bias2, tm=8, tn=128, tk=128))
    y2_ref = _reference(x2, w2, d_in2, d_out2, bias2)
    assert y2.shape == (batch2, seq2, out2)
    assert jnp.allclose(y2, y2_ref, atol=1e-3, rtol=1e-5)

    # --- case 3: bf16 compute path + v7x megacore N-split (grid_m == 1 -> grid_n >= 2) ---
    batch3, seq3 = 4, 32
    in3, out3 = 512, 512
    x3 = jax.random.normal(k_x3, (batch3, seq3, in3), jnp.float32)
    w3, d_in3, d_out3, bias3 = make_ia3_params(k_p3, in3, out3,
                                               mode="in_out", bias=True)
    y3 = jax.block_until_ready(
        ia3_linear(x3, w3, d_in3, d_out3, bias3, compute_dtype=jnp.bfloat16))
    y3_ref = _reference(x3, w3, d_in3, d_out3, bias3)
    rel_err = jnp.linalg.norm(y3 - y3_ref) / jnp.linalg.norm(y3_ref)
    assert y3.shape == (batch3, seq3, out3)
    assert rel_err < 2e-2, float(rel_err)

    print("KERNEL_OK")
</pallas_src>

<mosaic_0001>
module attributes {stable_mosaic.version = 11 : i64} {
  func.func @_ia3_kernel_single_k(%arg0: i32, %arg1: i32, %arg2: i32, %arg3: memref<16x32xf32, #tpu.memory_space<vmem>>, %arg4: memref<32x128xf32, #tpu.memory_space<vmem>>, %arg5: memref<1x32xf32, #tpu.memory_space<vmem>>, %arg6: memref<1x128xf32, #tpu.memory_space<vmem>>, %arg7: memref<1x128xf32, #tpu.memory_space<vmem>>, %arg8: memref<16x128xf32, #tpu.memory_space<vmem>>) attributes {dimension_semantics = [#tpu.dimension_semantics<parallel>, #tpu.dimension_semantics<parallel>, #tpu.dimension_semantics<arbitrary>], iteration_bounds = array<i64: 1, 1, 1>, scalar_prefetch = 0 : i64, scratch_operands = 0 : i64, tpu.core_type = #tpu.core_type<tc>, window_params = [{transform_indices = @transform_0, window_bounds = array<i64: 16, 32>}, {transform_indices = @transform_1, window_bounds = array<i64: 32, 128>}, {pipeline_mode = #tpu.pipeline_mode<synchronous>, transform_indices = @transform_2, window_bounds = array<i64: 1, 32>}, {pipeline_mode = #tpu.pipeline_mode<synchronous>, transform_indices = @transform_3, window_bounds = array<i64: 1, 128>}, {pipeline_mode = #tpu.pipeline_mode<synchronous>, transform_indices = @transform_4, window_bounds = array<i64: 1, 128>}, {transform_indices = @transform_5, window_bounds = array<i64: 16, 128>}]} {
    %c0 = arith.constant 0 : index
    %c0_0 = arith.constant 0 : index
    %0 = vector.load %arg3[%c0, %c0_0] : memref<16x32xf32, #tpu.memory_space<vmem>>, vector<16x32xf32>
    %c0_1 = arith.constant 0 : index
    %c0_2 = arith.constant 0 : index
    %1 = vector.load %arg5[%c0_1, %c0_2] : memref<1x32xf32, #tpu.memory_space<vmem>>, vector<1x32xf32>
    %2 = vector.broadcast %1 : vector<1x32xf32> to vector<16x32xf32>
    %3 = arith.mulf %0, %2 : vector<16x32xf32>
    %c0_3 = arith.constant 0 : index
    %c0_4 = arith.constant 0 : index
    %4 = vector.load %arg4[%c0_3, %c0_4] : memref<32x128xf32, #tpu.memory_space<vmem>>, vector<32x128xf32>
    %cst = arith.constant dense<0.000000e+00> : vector<16x128xf32>
    %5 = tpu.matmul %3, %4, %cst {dimension_numbers = #tpu.dot_dimension_numbers<[1], [0], [0], [1], [0, 0, 1, 1], [], []>} : vector<16x32xf32>, vector<32x128xf32>, vector<16x128xf32> -> vector<16x128xf32>
    %c128_i32 = arith.constant 128 : i32
    %6 = arith.muli %arg1, %c128_i32 : i32
    %7 = tpu.assume_multiple %6, 128 : i32
    %c0_5 = arith.constant 0 : index
    %8 = arith.index_cast %7 : i32 to index
    %9 = vector.load %arg6[%c0_5, %8] : memref<1x128xf32, #tpu.memory_space<vmem>>, vector<1x128xf32>
    %10 = vector.broadcast %9 : vector<1x128xf32> to vector<16x128xf32>
    %11 = arith.mulf %5, %10 : vector<16x128xf32>
    %c0_6 = arith.constant 0 : index
    %12 = arith.index_cast %7 : i32 to index
    %13 = vector.load %arg7[%c0_6, %12] : memref<1x128xf32, #tpu.memory_space<vmem>>, vector<1x128xf32>
    %14 = vector.broadcast %13 : vector<1x128xf32> to vector<16x128xf32>
    %15 = arith.addf %11, %14 : vector<16x128xf32>
    %c0_7 = arith.constant 0 : index
    %c0_8 = arith.constant 0 : index
    %16 = vector.load %arg8[%c0_7, %c0_8] : memref<16x128xf32, #tpu.memory_space<vmem>>, vector<16x128xf32>
    tpu.vector_store %arg8[%c0_7, %c0_8], %15 {strides = array<i32>} : memref<16x128xf32, #tpu.memory_space<vmem>>, vector<16x128xf32>,
    return
  }
  func.func @transform_0(%arg0: i32, %arg1: i32, %arg2: i32) -> (i32, i32) {
    %c0_i32 = arith.constant 0 : i32
    return %arg0, %arg2 : i32, i32
  }
  func.func @transform_1(%arg0: i32, %arg1: i32, %arg2: i32) -> (i32, i32) {
    %c0_i32 = arith.constant 0 : i32
    return %arg2, %arg1 : i32, i32
  }
  func.func @transform_2(%arg0: i32, %arg1: i32, %arg2: i32) -> (i32, i32) {
    %c0_i32 = arith.constant 0 : i32
    %c0_i32_0 = arith.constant 0 : i32
    %c0_i32_1 = arith.constant 0 : i32
    return %c0_i32, %c0_i32_0 : i32, i32
  }
  func.func @transform_3(%arg0: i32, %arg1: i32, %arg2: i32) -> (i32, i32) {
    %c0_i32 = arith.constant 0 : i32
    %c0_i32_0 = arith.constant 0 : i32
    %c0_i32_1 = arith.constant 0 : i32
    return %c0_i32, %c0_i32_0 : i32, i32
  }
  func.func @transform_4(%arg0: i32, %arg1: i32, %arg2: i32) -> (i32, i32) {
    %c0_i32 = arith.constant 0 : i32
    %c0_i32_0 = arith.constant 0 : i32
    %c0_i32_1 = arith.constant 0 : i32
    return %c0_i32, %c0_i32_0 : i32, i32
  }
  func.func @transform_5(%arg0: i32, %arg1: i32, %arg2: i32) -> (i32, i32) {
    %c0_i32 = arith.constant 0 : i32
    return %arg0, %arg1 : i32, i32
  }
}

</mosaic_0001>

<bundles_post_ra>
// kernel: ia3_linear.1
= control target key start
LH: loop header
LB: loop body
LE: loop exit
PB: predicated region body
PF: predicated region fallthrough
CT: control target
= control target key end

     0   :  { %10 = vsyncpa [#allocation3], 0  ;;  %s290_s0 = inlined_call_operand.hbm [shape: f32[16,32], index: 0, kind: input, shape index: {}]   ;;  %s291_s1 = inlined_call_operand.hbm [shape: f32[32,128], index: 1, kind: input, shape index: {}]   ;;  %s292_s2 = inlined_call_operand.vmem [shape: f32[1,32], index: 2, kind: input, shape index: {}]   ;;  %s293_s3 = inlined_call_operand.vmem [shape: f32[1,128], index: 3, kind: input, shape index: {}]   ;;  %s294_s4 = inlined_call_operand.vmem [shape: f32[1,128], index: 4, kind: input, shape index: {}]   ;;  %s295_s5 = inlined_call_operand.hbm [shape: f32[16,128], index: 5, kind: output, shape index: {}]  }
   0x1   :  { %11 = vsyncpa [#allocation6], 0 }
   0x2   :  { %12 = vsyncpa [#allocation4], 0  ;;  %s17_s20 = sshll.u32 %s290_s0, 4  ;;  %s228_s21 = smov [#allocation2]   ;;  %s18_s20 = int_to_ptr.hbm [resolvable:$true] %s17_s20 }
   0x3   :  { %s19_s22 = sshll.u32 %s228_s21, 4  ;;  %s30_s25 = sshll.u32 %s291_s1, 4  ;;  %s20_s22 = int_to_ptr.vmem [resolvable:$true] %s19_s22  ;;  %s31_s25 = int_to_ptr.hbm [resolvable:$true] %s30_s25 }
   0x4   :  { %s229_s26 = smov 128   ;;  %s230_s27 = smov 8  }
   0x5   :  { %25 = dma.hbm_to_vmem [thread:$0]  %s18_s20, 256, %s20_s22, [#allocation3], %s229_s26, %s229_s26, %s230_s27  }
   0x6   :  { %s231_s28 = smov [#allocation5]  }
   0x7   :  { %s32_s29 = sshll.u32 %s231_s28, 4  ;;  %s33_s29 = int_to_ptr.vmem [resolvable:$true] %s32_s29 }
   0x8   :  { %38 = dma.hbm_to_vmem [thread:$0]  %s31_s25, 512, %s33_s29, [#allocation6], %s229_s26, %s229_s26, %s230_s27  }
   0x9   :  { %222 = dma.done.wait [#allocation3], 256  }
   0xa   :  { %223 = vsyncadd [#allocation3], 4294967040 }
   0xb   :  { %224 = dma.done.wait [#allocation6], 512  }
   0xc   :  { %225 = vsyncadd [#allocation6], 4294966784  ;;  %v64_v0 = vld [vmem:[#allocation5 + $0x18] sm:$0xff]  ;;  %v63_v1 = vld [vmem:[#allocation5 + $0x10] sm:$0xff]  ;;  %vm65_vm0 = vcmask 261120   ;;  %s120_s12 = sshll.u32 %s295_s5, 4  ;;  %s121_s12 = int_to_ptr.hbm [resolvable:$true] %s120_s12 }
   0xd   :  { %84 = vmatpush.msra.mxu0 %v64_v0  ;;  %138 = vmatpush.msra.mxu1 %v64_v0  ;;  %v62_v2 = vld [vmem:[#allocation5 + $0x8] sm:$0xff]  ;;  %v53_v3 = vld [vmem:[#allocation2] sm:$0xff]  ;;  %v54_v5 = vld [vmem:[#allocation2 + $0x8] sm:$0xff] }
   0xe   :  { %v147_v4 = vld [vmem:[%s292_s2] ss:$0 sm:$0xff]  ;;  %v61_v6 = vld [vmem:[#allocation5] sm:$0xff]  ;;  %s232_s2 = smov [#allocation7]  }
   0xf   :  { %85 = vmatpush.msra.mxu0 %v63_v1  ;;  %139 = vmatpush.msra.mxu1 %v63_v1  ;;  %v59_v7 = vmul.f32 %v147_v4, %v53_v3  ;;  %v60_v8 = vmul.f32 %v147_v4, %v54_v5  ;;  %v148_v9 = vld [vmem:[%s293_s3] ss:$0 sm:$0xff]  ;;  %s118_s9 = sshll.u32 %s232_s2, 4  ;;  %s119_s9 = int_to_ptr.vmem [resolvable:$true] %s118_s9 }
  0x10   :  { %v149_v10 = vld [vmem:[%s294_s4] ss:$0 sm:$0xff] }
  0x11   :  { %86 = vmatpush.msra.mxu0 %v62_v2  ;;  %140 = vmatpush.msra.mxu1 %v62_v2 }
  0x13   :  { %87 = vmatpush.msra.mxu0 %v61_v6  ;;  %141 = vmatpush.msra.mxu1 %v61_v6 }
  0x14   :  { %136 = vmatmul.msk.f32.vlgmr.msra.gmra.mxu0 %vm65_vm0, %v59_v7  ;;  %137 = vmatmul.msk.f32.vlgmr.msra.gmra.mxu1 %vm65_vm0, %v60_v8 }
  0x91   :  { %v89_v11 = vpop.f32.mrf.mxu0  ;;  %v92_v12 = vpop.f32.mrf.mxu1 }
  0x92   :  { %v103_v13 = vmul.f32 %v148_v9, %v89_v11  ;;  %v104_v14 = vmul.f32 %v148_v9, %v92_v12 }
  0x94   :  { %v110_v15 = vadd.f32 %v149_v10, %v103_v13  ;;  %v111_v16 = vadd.f32 %v149_v10, %v104_v14 }
  0x96   :  { %112 = vst [vmem:[#allocation7] sm:$0xff] %v110_v15 }
  0x97   :  { %113 = vst [vmem:[#allocation7 + $0x8] sm:$0xff] %v111_v16 }
  0x98   :  { %126 = dma.vmem_to_hbm [thread:$0]  %s119_s9, 256, %s121_s12, [#allocation4], %s229_s26, %s229_s26, %s230_s27  }
  0x99   :  { %226 = dma.done.wait [#allocation4], 256  }
  0x9a   :  { %227 = vsyncadd [#allocation4], 4294967040 }
  0x9b   :  { %131 = vsyncpa [#allocation3], 1 }
  0x9c   :  { %132 = vsyncpa [#allocation6], 1 }
  0x9d   :  { %133 = vsyncpa [#allocation4], 1 }

</bundles_post_ra>
